<compile_context>
chip_gen: v5e
topology: v5e:2x2
jax: 0.10.0
libtpu: 0.0.40
codegen_flags: <defaults>
</compile_context>

<pallas_src>
import functools
import math

import jax
import jax.numpy as jnp
from jax import lax
from jax.experimental import pallas as pl
from jax.experimental.pallas import tpu as pltpu


def _ntxent_kernel(zi_ref, zj_ref, o_ref, zc_ref, pc_ref, *, temperature: float, beta: float):
    # zi_ref, zj_ref: (B, D) in VMEM ; o_ref: (1, 1) scalar loss in SMEM
    # zc_ref: (2B, D) f32 scratch (concatenated normalized z) ; pc_ref: (2B, 1) f32 scratch (pos logit)
    B, D = zi_ref.shape
    N = 2 * B
    inv_t = 1.0 / temperature

    zi = zi_ref[...].astype(jnp.float32)
    zj = zj_ref[...].astype(jnp.float32)

    # --- F.normalize(z, dim=1): x * (1 / max(||x||, eps)) ; divide only touches (B,1) ------
    inv_ni = 1.0 / jnp.maximum(jnp.sqrt(jnp.sum(zi * zi, axis=1, keepdims=True)), 1e-12)
    inv_nj = 1.0 / jnp.maximum(jnp.sqrt(jnp.sum(zj * zj, axis=1, keepdims=True)), 1e-12)
    zni = zi * inv_ni
    znj = zj * inv_nj

    # --- assemble concatenated normalized z in VMEM scratch (no HBM concat) ----------------
    zc_ref[0:B, :] = zni
    zc_ref[B:N, :] = znj
    z_all = zc_ref[...]                      # (2B, D)
    lhs = z_all * inv_t                      # fold 1/T into one matmul operand

    # --- logits = (z/T) @ z.T as an NT contraction (no explicit transpose) -----------------
    logits = lax.dot_general(
        lhs, z_all, (((1,), (1,)), ((), ())), preferred_element_type=jnp.float32
    )                                        # (2B, 2B)

    # --- positive logit: <zn_i, zn_j>/T, identical for row i and row i+B --------------------
    p = jnp.sum((zni * inv_t) * znj, axis=1, keepdims=True)      # (B, 1)
    pc_ref[0:B, :] = p
    pc_ref[B:N, :] = p
    pos = pc_ref[...]                                            # (2B, 1)

    # --- masks (2-D iota required on TPU); no modulo needed ---------------------------------
    row = lax.broadcasted_iota(jnp.int32, (N, N), 0)
    col = lax.broadcasted_iota(jnp.int32, (N, N), 1)
    diag = row == col

    if beta > 0.0:
        # NOTE: degenerate for B == 1 (zero negatives), same as the PyTorch original.
        # negatives = everything except the diagonal and the positive column
        notneg = diag | (col == row + B) | (col == row - B)
        neg = jnp.where(notneg, -jnp.inf, logits)                # single (N,N) rewrite
        m = N - 2                                                # negatives per row

        # log Z_beta = logsumexp(beta * neg, axis=1) - log(m)
        bn = beta * neg
        mx_b = jnp.max(bn, axis=1, keepdims=True)
        lse_b = mx_b + jnp.log(jnp.sum(jnp.exp(bn - mx_b), axis=1, keepdims=True))
        log_z = lse_b - math.log(m)

        # logsumexp over rewritten negatives (beta+1)*l - log_z, fused (log_z is per-row const)
        g = (beta + 1.0) * neg
        mx_g = jnp.max(g, axis=1, keepdims=True)
        lse_neg = mx_g + jnp.log(jnp.sum(jnp.exp(g - mx_g), axis=1, keepdims=True)) - log_z

        # row logsumexp = logaddexp(lse over negatives, unchanged positive logit)
        mr = jnp.maximum(lse_neg, pos)
        lse_row = mr + jnp.log(jnp.exp(lse_neg - mr) + jnp.exp(pos - mr))
    else:
        # fill_diagonal_(-inf) then row logsumexp (positive column left untouched)
        masked = jnp.where(diag, -jnp.inf, logits)
        mx = jnp.max(masked, axis=1, keepdims=True)
        lse_row = mx + jnp.log(jnp.sum(jnp.exp(masked - mx), axis=1, keepdims=True))

    # cross_entropy(logits, pos_idx) = mean( logsumexp(row) - logits[row, pos] )
    o_ref[0, 0] = jnp.mean(lse_row - pos)


def ntxent_general(z_i, z_j, temperature: float = 0.5, beta: float = 0.0):
    """Pallas implementation of NTXent_general.forward (returns scalar loss)."""
    B, D = z_i.shape
    N = 2 * B
    kernel = functools.partial(
        _ntxent_kernel, temperature=float(temperature), beta=float(beta)
    )
    # size scoped VMEM to the actual working set (a handful of (N,N) f32 planes + z tiles)
    need = 10 * N * N * 4 + 8 * N * D * 4 + (2 << 20)
    vmem_limit = int(max(32 << 20, min(need, 112 << 20)))
    out = pl.pallas_call(
        kernel,
        out_shape=jax.ShapeDtypeStruct((1, 1), jnp.float32),
        in_specs=[
            pl.BlockSpec(memory_space=pltpu.MemorySpace.VMEM),
            pl.BlockSpec(memory_space=pltpu.MemorySpace.VMEM),
        ],
        out_specs=pl.BlockSpec(memory_space=pltpu.MemorySpace.SMEM),
        scratch_shapes=[
            pltpu.VMEM((N, D), jnp.float32),   # concatenated normalized z
            pltpu.VMEM((N, 1), jnp.float32),   # per-row positive logit
        ],
        compiler_params=pltpu.CompilerParams(vmem_limit_bytes=vmem_limit),
    )(z_i, z_j)
    return out[0, 0]


# ---- pure-JAX reference (mirrors the PyTorch forward) for a silent sanity check ------
def _ntxent_ref(z_i, z_j, temperature=0.5, beta=0.0):
    z = jnp.concatenate([z_i, z_j], axis=0).astype(jnp.float32)
    N = z.shape[0]
    B = N // 2
    zn = z / jnp.maximum(jnp.linalg.norm(z, axis=1, keepdims=True), 1e-12)
    logits = zn @ zn.T / temperature
    row = jnp.arange(N)[:, None]
    col = jnp.arange(N)[None, :]
    diag = row == col
    pos = col == ((row + B) % N)
    if beta > 0.0:
        neg = ~(diag | pos)
        m = N - 2
        masked = jnp.where(neg, beta * logits, -jnp.inf)
        log_z = jax.nn.logsumexp(masked, axis=1, keepdims=True) - math.log(m)
        logits = jnp.where(neg, (beta + 1.0) * logits - log_z, logits)
    logits = jnp.where(diag, -jnp.inf, logits)
    lse = jax.nn.logsumexp(logits, axis=1)
    pos_logit = jnp.sum(jnp.where(pos, logits, 0.0), axis=1)
    return jnp.mean(lse - pos_logit)


if __name__ == "__main__":
    key = jax.random.PRNGKey(0)
    k1, k2 = jax.random.split(key)
    B, D = 8, 32
    z_i = jax.random.normal(k1, (B, D), dtype=jnp.float32)
    z_j = jax.random.normal(k2, (B, D), dtype=jnp.float32)

    # default configuration (temperature=0.5, beta=0.0)
    loss0 = jax.block_until_ready(ntxent_general(z_i, z_j, temperature=0.5, beta=0.0))
    ref0 = _ntxent_ref(z_i, z_j, temperature=0.5, beta=0.0)
    assert jnp.allclose(loss0, ref0, rtol=1e-5, atol=1e-5), (loss0, ref0)

    # beta > 0 path
    loss1 = jax.block_until_ready(ntxent_general(z_i, z_j, temperature=0.5, beta=0.5))
    ref1 = _ntxent_ref(z_i, z_j, temperature=0.5, beta=0.5)
    assert jnp.allclose(loss1, ref1, rtol=1e-5, atol=1e-5), (loss1, ref1)

    print("KERNEL_OK")
</pallas_src>

<mosaic_0001>
module attributes {stable_mosaic.version = 11 : i64} {
  func.func @_ntxent_kernel(%arg0: memref<8x32xf32, #tpu.memory_space<vmem>>, %arg1: memref<8x32xf32, #tpu.memory_space<vmem>>, %arg2: memref<1x1xf32, #tpu.memory_space<smem>>, %arg3: memref<16x32xf32, #tpu.memory_space<vmem>>, %arg4: memref<16x1xf32, #tpu.memory_space<vmem>>) attributes {dimension_semantics = [], scalar_prefetch = 0 : i64, scratch_operands = 2 : i64, tpu.core_type = #tpu.core_type<tc>} {
    %c0 = arith.constant 0 : index
    %c0_0 = arith.constant 0 : index
    %0 = vector.load %arg0[%c0, %c0_0] : memref<8x32xf32, #tpu.memory_space<vmem>>, vector<8x32xf32>
    %c0_1 = arith.constant 0 : index
    %c0_2 = arith.constant 0 : index
    %1 = vector.load %arg1[%c0_1, %c0_2] : memref<8x32xf32, #tpu.memory_space<vmem>>, vector<8x32xf32>
    %2 = arith.mulf %0, %0 : vector<8x32xf32>
    %cst = arith.constant dense<0.000000e+00> : vector<8xf32>
    %3 = vector.multi_reduction <add>, %2, %cst [1] : vector<8x32xf32> to vector<8xf32>
    %4 = vector.shape_cast %3 : vector<8xf32> to vector<8x1xf32>
    %5 = math.sqrt %4 : vector<8x1xf32>
    %cst_3 = arith.constant 9.99999996E-13 : f32
    %6 = vector.broadcast %cst_3 : f32 to vector<8x1xf32>
    %7 = arith.maximumf %5, %6 : vector<8x1xf32>
    %cst_4 = arith.constant 1.000000e+00 : f32
    %8 = vector.broadcast %cst_4 : f32 to vector<8x1xf32>
    %9 = arith.divf %8, %7 : vector<8x1xf32>
    %10 = arith.mulf %1, %1 : vector<8x32xf32>
    %cst_5 = arith.constant dense<0.000000e+00> : vector<8xf32>
    %11 = vector.multi_reduction <add>, %10, %cst_5 [1] : vector<8x32xf32> to vector<8xf32>
    %12 = vector.shape_cast %11 : vector<8xf32> to vector<8x1xf32>
    %13 = math.sqrt %12 : vector<8x1xf32>
    %cst_6 = arith.constant 9.99999996E-13 : f32
    %14 = vector.broadcast %cst_6 : f32 to vector<8x1xf32>
    %15 = arith.maximumf %13, %14 : vector<8x1xf32>
    %cst_7 = arith.constant 1.000000e+00 : f32
    %16 = vector.broadcast %cst_7 : f32 to vector<8x1xf32>
    %17 = arith.divf %16, %15 : vector<8x1xf32>
    %18 = vector.broadcast %9 : vector<8x1xf32> to vector<8x32xf32>
    %19 = arith.mulf %0, %18 : vector<8x32xf32>
    %20 = vector.broadcast %17 : vector<8x1xf32> to vector<8x32xf32>
    %21 = arith.mulf %1, %20 : vector<8x32xf32>
    %c0_8 = arith.constant 0 : index
    %c0_9 = arith.constant 0 : index
    %22 = vector.load %arg3[%c0_8, %c0_9] : memref<16x32xf32, #tpu.memory_space<vmem>>, vector<8x32xf32>
    tpu.vector_store %arg3[%c0_8, %c0_9], %19 {strides = array<i32>} : memref<16x32xf32, #tpu.memory_space<vmem>>, vector<8x32xf32>,
    %c8 = arith.constant 8 : index
    %c0_10 = arith.constant 0 : index
    %23 = vector.load %arg3[%c8, %c0_10] : memref<16x32xf32, #tpu.memory_space<vmem>>, vector<8x32xf32>
    tpu.vector_store %arg3[%c8, %c0_10], %21 {strides = array<i32>} : memref<16x32xf32, #tpu.memory_space<vmem>>, vector<8x32xf32>,
    %c0_11 = arith.constant 0 : index
    %c0_12 = arith.constant 0 : index
    %24 = vector.load %arg3[%c0_11, %c0_12] : memref<16x32xf32, #tpu.memory_space<vmem>>, vector<16x32xf32>
    %cst_13 = arith.constant 2.000000e+00 : f32
    %25 = vector.broadcast %cst_13 : f32 to vector<16x32xf32>
    %26 = arith.mulf %24, %25 : vector<16x32xf32>
    %cst_14 = arith.constant dense<0.000000e+00> : vector<16x16xf32>
    %27 = tpu.matmul %26, %24, %cst_14 {dimension_numbers = #tpu.dot_dimension_numbers<[1], [1], [0], [0], [0, 0, 1, 0], [], []>} : vector<16x32xf32>, vector<16x32xf32>, vector<16x16xf32> -> vector<16x16xf32>
    %cst_15 = arith.constant 2.000000e+00 : f32
    %28 = vector.broadcast %cst_15 : f32 to vector<8x32xf32>
    %29 = arith.mulf %19, %28 : vector<8x32xf32>
    %30 = arith.mulf %29, %21 : vector<8x32xf32>
    %cst_16 = arith.constant dense<0.000000e+00> : vector<8xf32>
    %31 = vector.multi_reduction <add>, %30, %cst_16 [1] : vector<8x32xf32> to vector<8xf32>
    %32 = vector.shape_cast %31 : vector<8xf32> to vector<8x1xf32>
    %c0_17 = arith.constant 0 : index
    %c0_18 = arith.constant 0 : index
    %33 = vector.load %arg4[%c0_17, %c0_18] : memref<16x1xf32, #tpu.memory_space<vmem>>, vector<8x1xf32>
    tpu.vector_store %arg4[%c0_17, %c0_18], %32 {strides = array<i32>} : memref<16x1xf32, #tpu.memory_space<vmem>>, vector<8x1xf32>,
    %c8_19 = arith.constant 8 : index
    %c0_20 = arith.constant 0 : index
    %34 = vector.load %arg4[%c8_19, %c0_20] : memref<16x1xf32, #tpu.memory_space<vmem>>, vector<8x1xf32>
    tpu.vector_store %arg4[%c8_19, %c0_20], %32 {strides = array<i32>} : memref<16x1xf32, #tpu.memory_space<vmem>>, vector<8x1xf32>,
    %c0_21 = arith.constant 0 : index
    %c0_22 = arith.constant 0 : index
    %35 = vector.load %arg4[%c0_21, %c0_22] : memref<16x1xf32, #tpu.memory_space<vmem>>, vector<16x1xf32>
    %36 = tpu.iota {dimensions = array<i32: 0>} : vector<16x16xi32>
    %37 = tpu.iota {dimensions = array<i32: 1>} : vector<16x16xi32>
    %38 = arith.cmpi eq, %36, %37 : vector<16x16xi32>
    %cst_23 = arith.constant 0xFF800000 : f32
    %39 = vector.broadcast %cst_23 : f32 to vector<16x16xf32>
    %40 = arith.select %38, %39, %27 : vector<16x16xi1>, vector<16x16xf32>
    %cst_24 = arith.constant dense<0xFF800000> : vector<16xf32>
    %41 = vector.multi_reduction <maximumf>, %40, %cst_24 [1] : vector<16x16xf32> to vector<16xf32>
    %42 = vector.shape_cast %41 : vector<16xf32> to vector<16x1xf32>
    %43 = vector.broadcast %42 : vector<16x1xf32> to vector<16x16xf32>
    %44 = arith.subf %40, %43 : vector<16x16xf32>
    %45 = math.exp %44 : vector<16x16xf32>
    %cst_25 = arith.constant dense<0.000000e+00> : vector<16xf32>
    %46 = vector.multi_reduction <add>, %45, %cst_25 [1] : vector<16x16xf32> to vector<16xf32>
    %47 = vector.shape_cast %46 : vector<16xf32> to vector<16x1xf32>
    %48 = math.log %47 : vector<16x1xf32>
    %49 = arith.addf %42, %48 : vector<16x1xf32>
    %50 = arith.subf %49, %35 : vector<16x1xf32>
    %51 = vector.shape_cast %50 : vector<16x1xf32> to vector<1x16x1xf32>
    %cst_26 = arith.constant dense<0.000000e+00> : vector<1xf32>
    %52 = vector.multi_reduction <add>, %51, %cst_26 [1, 2] : vector<1x16x1xf32> to vector<1xf32>
    %53 = vector.shape_cast %52 : vector<1xf32> to vector<1x1x1xf32>
    %54 = vector.extract %53[0, 0, 0] : f32 from vector<1x1x1xf32>
    %cst_27 = arith.constant 1.600000e+01 : f32
    %55 = arith.divf %54, %cst_27 : f32
    %c0_28 = arith.constant 0 : index
    %c0_29 = arith.constant 0 : index
    %56 = memref.load %arg2[%c0_28, %c0_29] : memref<1x1xf32, #tpu.memory_space<smem>>
    memref.store %55, %arg2[%c0_28, %c0_29] : memref<1x1xf32, #tpu.memory_space<smem>>
    return
  }
}

</mosaic_0001>

<bundles_post_ra>
// kernel: tpu_custom_call.1
= control target key start
LH: loop header
LB: loop body
LE: loop exit
PB: predicated region body
PF: predicated region fallthrough
CT: control target
= control target key end

     0   :  { %7 = vsyncpa [#allocation5], 0  ;;  %s386_s0 = inlined_call_operand.hbm [shape: f32[8,32], index: 0, kind: input, shape index: {}]   ;;  %s387_s1 = inlined_call_operand.hbm [shape: f32[8,32], index: 1, kind: input, shape index: {}]   ;;  %s388_s2 = inlined_call_operand.hbm [shape: f32[1,1], index: 2, kind: output, shape index: {}]  }
   0x1   :  { %8 = vsyncpa [#allocation8], 0 }
   0x2   :  { %9 = vsyncpa [#allocation6], 0  ;;  %s15_s11 = sshll.u32 %s386_s0, 4  ;;  %s334_s12 = smov [#allocation4]   ;;  %s16_s11 = int_to_ptr.hbm [resolvable:$true] %s15_s11 }
   0x3   :  { %s17_s13 = sshll.u32 %s334_s12, 4  ;;  %s26_s16 = sshll.u32 %s387_s1, 4  ;;  %s18_s13 = int_to_ptr.vmem [resolvable:$true] %s17_s13  ;;  %s27_s16 = int_to_ptr.hbm [resolvable:$true] %s26_s16 }
   0x4   :  { %20 = dma.hbm_to_vmem [thread:$0]  %s16_s11, 128, %s18_s13, [#allocation5]  }
   0x5   :  { %s335_s17 = smov [#allocation7]  }
   0x6   :  { %s28_s18 = sshll.u32 %s335_s17, 4  ;;  %s29_s18 = int_to_ptr.vmem [resolvable:$true] %s28_s18 }
   0x7   :  { %31 = dma.hbm_to_vmem [thread:$0]  %s27_s16, 128, %s29_s18, [#allocation8]  }
   0x8   :  { %328 = dma.done.wait [#allocation5], 128  }
   0x9   :  { %329 = vsyncadd [#allocation5], 4294967168 }
   0xa   :  { %330 = dma.done.wait [#allocation8], 128  }
   0xb   :  { %331 = vsyncadd [#allocation8], 4294967168  ;;  %v41_v0 = vld [vmem:[#allocation7] sm:$0xff]  ;;  %vm43_vm0 = vcmask 261120   ;;  %v359_v2 = vld [vmem:[#allocation4] sm:$0xff]  ;;  %vm155_vm13 = vcmask 7168   ;;  %v160_v60 = vlaneseq }
   0xc   :  { %v75_v1 = vmul.f32 %v41_v0, %v41_v0  ;;  %v42_v4 = vmul.f32 %v359_v2, %v359_v2  ;;  %vm169_vm15 = vcmask 130048   ;;  %s224_s19 = sshll.u32 %s388_s2, 4  ;;  %s337_s23 = smov [#allocation9]   ;;  %s225_s19 = int_to_ptr.hbm [resolvable:$true] %s224_s19 }
   0xd   :  { %v164_v61 = vand.u32 127, %v160_v60  ;;  %v161_v62 = vshrl.u32 %v160_v60, 7 }
   0xe   :  { %v76_v3 = vsel %vm43_vm0, %v75_v1, 0.0  ;;  %v44_v5 = vsel %vm43_vm0, %v42_v4, 0.0 }
   0xf   :  { %77 = vadd.xlane.f32.xlu0 %v76_v3  ;;  %vm165_vm14 = vcmp.eq.s32.totalorder %v161_v62, %v164_v61 }
  0x17   :  { %45 = vadd.xlane.f32.xlu0 %v44_v5 }
  0x82   :  { %v78_v6 = vpop.xlane.xlu0 %77 }
  0x83   :  { %250 = vrsqrt.f32 %v78_v6  ;;  %vm86_vm1 = vcmp.eq.f32.partialorder %v78_v6, inf  ;;  %v89_v18 = vand.u32 2147483648, %v78_v6  ;;  %vm88_vm2 = vcmp.eq.f32.partialorder %v78_v6, 0.0 }
  0x89   :  { %v251_v7 = vpop.eup %250 }
  0x8a   :  { %v80_v8 = vmul.f32 %v251_v7, %v78_v6  ;;  %v46_v9 = vpop.xlane.xlu0 %45 }
  0x8b   :  { %252 = vrsqrt.f32 %v46_v9  ;;  %vm54_vm3 = vcmp.eq.f32.partialorder %v46_v9, inf  ;;  %v57_v26 = vand.u32 2147483648, %v46_v9  ;;  %vm56_vm4 = vcmp.eq.f32.partialorder %v46_v9, 0.0 }
  0x8c   :  { %v81_v10 = vmul.f32 %v251_v7, %v80_v8 }
  0x8e   :  { %v82_v11 = vmul.f32 0.5, %v81_v10 }
  0x90   :  { %v83_v12 = vsub.f32 1.5, %v82_v11 }
  0x91   :  { %v253_v13 = vpop.eup %252 }
  0x92   :  { %v84_v14 = vmul.f32 %v251_v7, %v83_v12  ;;  %v48_v15 = vmul.f32 %v253_v13, %v46_v9 }
  0x94   :  { %v85_v16 = vmul.f32 %v84_v14, %v78_v6  ;;  %v49_v17 = vmul.f32 %v253_v13, %v48_v15 }
  0x96   :  { %v87_v19 = vsel %vm86_vm1, %v78_v6, %v85_v16  ;;  %v50_v20 = vmul.f32 0.5, %v49_v17 }
  0x97   :  { %v90_v21 = vsel %vm88_vm2, %v89_v18, %v87_v19 }
  0x98   :  { %v91_v22 = vmax.f32 %v90_v21, 1e-12  ;;  %v51_v23 = vsub.f32 1.5, %v50_v20 }
  0x9a   :  { %254 = vrcp.f32 %v91_v22  ;;  %v52_v24 = vmul.f32 %v253_v13, %v51_v23  ;;  %v103_v33 = vand.u32 2147483648, %v91_v22  ;;  %v101_v35 = vand.u32 2147483647, %v91_v22 }
  0x9b   :  { %vm97_vm6 = vweird.f32 %v91_v22 }
  0x9c   :  { %v53_v25 = vmul.f32 %v52_v24, %v46_v9  ;;  %v104_v37 = vor.u32 1.1754944e-38, %v103_v33  ;;  %vm102_vm8 = vcmp.eq.f32.partialorder %v101_v35, 8.507059e+37 }
  0x9e   :  { %v55_v27 = vsel %vm54_vm3, %v46_v9, %v53_v25 }
  0x9f   :  { %v58_v29 = vsel %vm56_vm4, %v57_v26, %v55_v27 }
  0xa0   :  { %v255_v28 = vpop.eup %254  ;;  %v59_v31 = vmax.f32 %v58_v29, 1e-12 }
  0xa1   :  { %v93_v30 = vmul.f32 %v255_v28, %v91_v22  ;;  %vm98_vm5 = vweird.f32 %v255_v28 }
  0xa2   :  { %256 = vrcp.f32 %v59_v31  ;;  %vm99_vm7 = vmor %vm97_vm6, %vm98_vm5  ;;  %v71_v44 = vand.u32 2147483648, %v59_v31  ;;  %v69_v46 = vand.u32 2147483647, %v59_v31  ;;  %vm65_vm10 = vweird.f32 %v59_v31 }
  0xa3   :  { %v94_v32 = vsub.f32 1.0, %v93_v30 }
  0xa4   :  { %v72_v48 = vor.u32 1.1754944e-38, %v71_v44  ;;  %vm70_vm12 = vcmp.eq.f32.partialorder %v69_v46, 8.507059e+37 }
  0xa5   :  { %v95_v34 = vmul.f32 %v255_v28, %v94_v32 }
  0xa7   :  { %v96_v36 = vadd.f32 %v255_v28, %v95_v34 }
  0xa8   :  { %v257_v38 = vpop.eup %256 }
  0xa9   :  { %v100_v39 = vsel %vm99_vm7, %v255_v28, %v96_v36  ;;  %v61_v41 = vmul.f32 %v257_v38, %v59_v31  ;;  %vm66_vm9 = vweird.f32 %v257_v38  ;;  %v336_v31 = vmov 16.0  }
  0xaa   :  { %v105_v40 = vsel %vm102_vm8, %v104_v37, %v100_v39  ;;  %vm67_vm11 = vmor %vm65_vm10, %vm66_vm9 }
  0xab   :  { %v108_v42 = vmul.f32 %v105_v40, %v41_v0  ;;  %v62_v43 = vsub.f32 1.0, %v61_v41  ;;  %v162_v0 = vadd.s32 8, %v161_v62 }
  0xad   :  { %110 = vst.msk [vmem:[#allocation2 + $0x8] sm:$0xff] %vm43_vm0, %v108_v42  ;;  %v63_v45 = vmul.f32 %v257_v38, %v62_v43  ;;  %vm166_vm1 = vcmp.eq.s32.totalorder %v162_v0, %v164_v61 }
  0xaf   :  { %v64_v47 = vadd.f32 %v257_v38, %v63_v45 }
  0xb1   :  { %v68_v49 = vsel %vm67_vm11, %v257_v38, %v64_v47 }
  0xb2   :  { %v73_v50 = vsel %vm70_vm12, %v72_v48, %v68_v49 }
  0xb3   :  { %v107_v52 = vmul.f32 %v73_v50, %v359_v2 }
  0xb4   :  { %v112_v51 = vld [vmem:[#allocation2 + $0x8] sm:$0xff] }
  0xb5   :  { %236 = vmatpush.xpose.msk.msra.mxu0 %vm43_vm0, %v112_v51  ;;  %240 = vmatpush.xpose.msk.msra.mxu1 %vm43_vm0, %v112_v51  ;;  %v150_v53 = vmul.f32 2.0, %v107_v52  ;;  %109 = vst.msk [vmem:[#allocation2] sm:$0xff] %vm43_vm0, %v107_v52  ;;  %v114_v58 = vmul.f32 2.0, %v112_v51 }
  0xb7   :  { %v151_v54 = vmul.f32 %v150_v53, %v108_v42 }
  0xb9   :  { %v152_v55 = vsel %vm43_vm0, %v151_v54, 0.0 }
  0xba   :  { %153 = vadd.xlane.f32.xlu0 %v152_v55 }
  0xbc   :  { %v111_v56 = vld [vmem:[#allocation2] sm:$0xff] }
  0xbd   :  { %237 = vmatpush.xpose.msk.msra.mxu0 %vm43_vm0, %v111_v56  ;;  %241 = vmatpush.xpose.msk.msra.mxu1 %vm43_vm0, %v111_v56  ;;  %v113_v57 = vmul.f32 2.0, %v111_v56 }
  0xc0   :  { %238 = vmatmul.msk.f32.vlgmr.msra.gmra.mxu0 %vm43_vm0, %v113_v57  ;;  %239 = vmatmul.msk.f32.vlgmr.msra.gmra.mxu1 %vm43_vm0, %v114_v58 }
 0x12d   :  { %v154_v59 = vpop.xlane.xlu0 %153 }
 0x12e   :  { %156 = vst.msk [vmem:[#allocation3] sm:$0xff] %vm155_vm13, %v154_v59 }
 0x12f   :  { %157 = vst.msk [vmem:[#allocation3 + $0x8] sm:$0xff] %vm155_vm13, %v154_v59 }
 0x135   :  { %v158_v23 = vld [vmem:[#allocation3] sm:$0xff] }
 0x136   :  { %v159_v26 = vld [vmem:[#allocation3 + $0x8] sm:$0xff] }
 0x13d   :  { %v144_v63 = vpop.f32.mrf.mxu0  ;;  %v147_v3 = vpop.f32.mrf.mxu1 }
 0x13e   :  { %v167_v1 = vsel %vm165_vm14, -inf, %v144_v63  ;;  %v168_v4 = vsel %vm166_vm1, -inf, %v147_v3 }
 0x13f   :  { %v170_v2 = vsel %vm169_vm15, %v167_v1, -inf  ;;  %v173_v5 = vsel %vm169_vm15, %v168_v4, -inf }
 0x140   :  { %171 = vmax.xlane.f32.xlu1 %v170_v2 }
 0x148   :  { %174 = vmax.xlane.f32.xlu1 %v173_v5 }
 0x1b3   :  { %v172_v6 = vpop.xlane.xlu1 %171 }
 0x1b4   :  { %v176_v7 = vsub.f32 %v167_v1, %v172_v6 }
 0x1b6   :  { %v178_v8 = vmul.f32 1.442695, %v176_v7 }
 0x1b8   :  { %258 = vpow2.f32 %v178_v8 }
 0x1bb   :  { %v175_v9 = vpop.xlane.xlu1 %174 }
 0x1bc   :  { %v177_v10 = vsub.f32 %v168_v4, %v175_v9 }
 0x1be   :  { %v259_v11 = vpop.eup %258  ;;  %v180_v12 = vmul.f32 1.442695, %v177_v10 }
 0x1bf   :  { %v182_v13 = vsel %vm169_vm15, %v259_v11, 0.0 }
 0x1c0   :  { %260 = vpow2.f32 %v180_v12  ;;  %183 = vadd.xlane.f32.xlu2 %v182_v13 }
 0x1c6   :  { %v261_v14 = vpop.eup %260 }
 0x1c7   :  { %v185_v15 = vsel %vm169_vm15, %v261_v14, 0.0 }
 0x1c8   :  { %186 = vadd.xlane.f32.xlu2 %v185_v15 }
 0x233   :  { %v184_v16 = vpop.xlane.xlu2 %183 }
 0x234   :  { %262 = vlog2.f32 %v184_v16 }
 0x23a   :  { %v263_v17 = vpop.eup %262 }
 0x23b   :  { %v187_v18 = vpop.xlane.xlu2 %186  ;;  %v189_v19 = vmul.f32 0.6931472, %v263_v17 }
 0x23c   :  { %264 = vlog2.f32 %v187_v18 }
 0x23d   :  { %v192_v20 = vadd.f32 %v189_v19, %v172_v6  ;;  %266 = vrcp.f32 %v336_v31 }
 0x23f   :  { %v194_v25 = vsub.f32 %v192_v20, %v158_v23 }
 0x241   :  { %v196_v28 = vsel %vm155_vm13, %v194_v25, 0.0 }
 0x242   :  { %v265_v21 = vpop.eup %264 }
 0x243   :  { %v191_v22 = vmul.f32 0.6931472, %v265_v21  ;;  %v267_v32 = vpop.eup %266 }
 0x244   :  { %v209_v33 = vmul.f32 16.0, %v267_v32  ;;  %vm213_vm0 = vweird.f32 %v267_v32 }
 0x245   :  { %v193_v24 = vadd.f32 %v191_v22, %v175_v9 }
 0x246   :  { %v210_v34 = vsub.f32 1.0, %v209_v33 }
 0x247   :  { %v195_v27 = vsub.f32 %v193_v24, %v159_v26 }
 0x248   :  { %v211_v38 = vmul.f32 %v267_v32, %v210_v34 }
 0x249   :  { %v197_v29 = vsel %vm155_vm13, %v195_v27, 0.0 }
 0x24a   :  { %v198_v30 = vadd.f32 %v197_v29, %v196_v28  ;;  %v212_v41 = vadd.f32 %v267_v32, %v211_v38 }
 0x24c   :  { %199 = vadd.xlane.f32.xlu1 %v198_v30  ;;  %v214_v44 = vsel %vm213_vm0, %v267_v32, %v212_v41 }
 0x2bf   :  { %v200_v35 = vpop.xlane.xlu1 %199 }
 0x2c0   :  { %v201_v36 = vrot.slane %v200_v35, 4 }
 0x2c2   :  { %v202_v37 = vadd.f32 %v201_v36, %v200_v35 }
 0x2c4   :  { %v203_v39 = vrot.slane %v202_v37, 2 }
 0x2c6   :  { %v204_v40 = vadd.f32 %v203_v39, %v202_v37 }
 0x2c8   :  { %v205_v42 = vrot.slane %v204_v40, 1 }
 0x2ca   :  { %v206_v43 = vadd.f32 %v205_v42, %v204_v40 }
 0x2cc   :  { %242 = vpush %v206_v43 }
 0x2cd   :  { %244 = vpush %v214_v44 }
 0x2fd   :  { %s243_s20 = spop %242 }
 0x2fe   :  { %s245_s21 = spop %244 }
 0x2ff   :  { %s216_s22 = smul.f32 %s245_s21, %s243_s20 }
 0x301   :  { %218 = sst [smem:[#allocation9]] %s216_s22 }
 0x302   :  { %227 = dma.smem_to_hbm %s337_s23, 16, %s225_s19, [#allocation6]  }
 0x303   :  { %332 = dma.done.wait [#allocation6], 16  }
 0x304   :  { %333 = vsyncadd [#allocation6], 4294967280 }
 0x305   :  { %232 = sfence }
 0x306   :  { %233 = vsyncpa [#allocation5], 1 }
 0x307   :  { %234 = vsyncpa [#allocation8], 1 }
 0x308   :  { %235 = vsyncpa [#allocation6], 1 }

</bundles_post_ra>
